<compile_context>
chip_gen: v5e
topology: v5e:2x2
jax: 0.10.0
libtpu: 0.0.40
codegen_flags: <defaults>
</compile_context>

<pallas_src>
import functools

import jax
import jax.numpy as jnp
from jax.experimental import pallas as pl
from jax.experimental.pallas import tpu as pltpu

_NEG_BIG = -1e30  # finite "-inf": avoids inf-inf NaNs in the online-softmax update


def _cdiv(a, b):
    return -(-a // b)


def _round_up(a, b):
    return _cdiv(a, b) * b


def _tpu_vmem_bytes():
    try:
        return int(pltpu.get_tpu_info().vmem_capacity_bytes)
    except Exception:
        return 64 * 1024 * 1024  # v7x (smallest per-core VMEM) as a safe fallback


def _choose_tile_ns(nd, itemsize):
    """~8 MiB streamed fvs tile (16 MiB double-buffered), scaled by chip VMEM."""
    vmem = _tpu_vmem_bytes()
    target_tile_bytes = min(8 << 20, vmem // 8)
    rows = max(8, target_tile_bytes // max(1, nd * itemsize))
    return int((rows // 8) * 8)


def _vmem_limit_bytes():
    vmem = _tpu_vmem_bytes()
    return int(min(vmem * 3 // 4, 96 * 1024 * 1024))


def _l1_agg_kernel(q_ref, fvs_ref, m_ref, l_ref, acc_ref, *,
                   ns, tile_ns, tiles_per_split, needs_mask):
    # q_ref   : (1, nd)        VMEM, resident (same dtype as fvs)
    # fvs_ref : (tile_ns, nd)  VMEM, streamed over the ns axis
    # m_ref   : (1, 1, 1)  f32 resident output block (per-split running max)
    # l_ref   : (1, 1, 1)  f32 resident output block (per-split running denom)
    # acc_ref : (1, 1, nd) f32 resident output block (per-split weighted sum)
    s = pl.program_id(1)

    @pl.when(s == 0)
    def _init():
        m_ref[0] = jnp.full((1, 1), _NEG_BIG, dtype=jnp.float32)
        l_ref[0] = jnp.zeros((1, 1), dtype=jnp.float32)
        acc_ref[0] = jnp.zeros(acc_ref.shape[1:], dtype=jnp.float32)

    q = q_ref[...]        # (1, nd)       -- no upcast
    fvs = fvs_ref[...]    # (tile_ns, nd) -- fed to the MXU as-is (bf16 or f32)

    # ek = q @ fvs^T, lane-dense (1, tile_ns), f32 accumulation on the MXU.
    ek = jax.lax.dot_general(
        q, fvs,
        dimension_numbers=(((1,), (1,)), ((), ())),
        preferred_element_type=jnp.float32)

    if needs_mask:
        # Only emitted when ns is not tile-aligned.  fvs is zero-padded in the
        # wrapper (so the p @ fvs matmul can't hit NaN garbage); masking ek
        # alone is enough: exp(-1e30 - m) underflows to exactly 0 once any
        # real row has set m, and an all-pad split is zeroed by the
        # exp(m - m_glob) factor in the wrapper merge.
        c = pl.program_id(0)
        start = (c * tiles_per_split + s) * tile_ns
        col = jax.lax.broadcasted_iota(jnp.int32, (1, tile_ns), 1) + start
        ek = jnp.where(col < ns, ek, _NEG_BIG)

    # Online-softmax update (all f32; ek/p are a single lane-dense row).
    m_prev = m_ref[0]                                           # (1, 1)
    m_new = jnp.maximum(m_prev, jnp.max(ek, axis=1, keepdims=True))
    alpha = jnp.exp(m_prev - m_new)                             # (1, 1)
    p = jnp.exp(ek - m_new)                                     # (1, tile_ns)

    l_ref[0] = alpha * l_ref[0] + jnp.sum(p, axis=1, keepdims=True)
    # Second contraction also on the MXU: (1, tile_ns) @ (tile_ns, nd).
    pv = jnp.dot(p.astype(fvs.dtype), fvs, preferred_element_type=jnp.float32)
    acc_ref[0] = alpha * acc_ref[0] + pv
    m_ref[0] = m_new


def l1_aggregator(q0, fvs, *, tile_ns=None, num_splits=2):
    """q0: (1, nd), fvs: (ns, nd) -> (1, nd) in fvs.dtype."""
    ns, nd = fvs.shape
    assert q0.shape == (1, nd)
    q0 = q0.astype(fvs.dtype)       # MXU consumes bf16 natively; tiny (1, nd) cast
    itemsize = jnp.dtype(fvs.dtype).itemsize

    if tile_ns is None:
        tile_ns = _choose_tile_ns(nd, itemsize)
    tile_ns = max(8, (int(tile_ns) // 8) * 8)      # sublane multiple
    tile_ns = min(tile_ns, _round_up(ns, 8))

    tiles_total = _cdiv(ns, tile_ns)
    num_splits = max(1, min(int(num_splits), tiles_total))
    tiles_per_split = _cdiv(tiles_total, num_splits)
    padded_ns = num_splits * tiles_per_split * tile_ns

    if padded_ns != ns:
        # Zero padding keeps the pad region NaN-free; only the lane-dense ek
        # mask runs in-kernel (trace-time conditional).
        fvs = jnp.pad(fvs, ((0, padded_ns - ns), (0, 0)))

    # NOTE: for nd < 128 each vreg row carries lane padding; repacking fvs so
    # the last dim is a multiple of 128 would recover VMEM/VPU efficiency, but
    # HBM traffic (the actual bottleneck) is unaffected, so we accept it.

    grid = (num_splits, tiles_per_split)
    kernel = functools.partial(
        _l1_agg_kernel, ns=ns, tile_ns=tile_ns,
        tiles_per_split=tiles_per_split, needs_mask=(padded_ns != ns))

    m, l, acc = pl.pallas_call(
        kernel,
        out_shape=(
            jax.ShapeDtypeStruct((num_splits, 1, 1), jnp.float32),   # running max
            jax.ShapeDtypeStruct((num_splits, 1, 1), jnp.float32),   # running denom
            jax.ShapeDtypeStruct((num_splits, 1, nd), jnp.float32),  # weighted sum
        ),
        grid_spec=pltpu.PrefetchScalarGridSpec(
            num_scalar_prefetch=0,
            grid=grid,
            in_specs=[
                pl.BlockSpec((1, nd), lambda c, s: (0, 0)),              # q0 resident
                pl.BlockSpec((tile_ns, nd),
                             lambda c, s, T=tiles_per_split: (c * T + s, 0)),
            ],
            out_specs=[
                pl.BlockSpec((1, 1, 1), lambda c, s: (c, 0, 0)),
                pl.BlockSpec((1, 1, 1), lambda c, s: (c, 0, 0)),
                pl.BlockSpec((1, 1, nd), lambda c, s: (c, 0, 0)),
            ],
        ),
        compiler_params=pltpu.CompilerParams(
            # Split axis may be sharded across TensorCores (v7x); the tile axis
            # is the serial online-softmax reduction.
            dimension_semantics=("parallel", "arbitrary"),
            vmem_limit_bytes=_vmem_limit_bytes(),
        ),
        cost_estimate=pl.CostEstimate(
            flops=4 * ns * nd,
            transcendentals=ns,
            bytes_accessed=int(padded_ns * nd * itemsize + 2 * nd * itemsize),
        ),
    )(q0, fvs)

    # Merge the per-split online-softmax partial states (O(num_splits * nd)).
    m = m[:, 0, :]
    l = l[:, 0, :]
    acc = acc[:, 0, :]
    m_glob = jnp.max(m, axis=0, keepdims=True)                  # (1, 1)
    scale = jnp.exp(m - m_glob)                                 # (num_splits, 1)
    l_glob = jnp.sum(l * scale, axis=0, keepdims=True)          # (1, 1)
    acc_glob = jnp.sum(acc * scale, axis=0, keepdims=True)      # (1, nd)
    return (acc_glob / l_glob).astype(fvs.dtype)


def l1_aggregator_ref(q0, fvs):
    ek = q0.astype(jnp.float32) @ fvs.astype(jnp.float32).T
    ak = jax.nn.softmax(ek, axis=1)
    return (ak @ fvs.astype(jnp.float32)).astype(fvs.dtype)


if __name__ == "__main__":
    fvdim = 32   # nd
    ns = 20      # deliberately not a multiple of the tile size

    # Parameter init exactly as in the PyTorch module: ones((1, fvdim))
    q0 = jnp.ones((1, fvdim), dtype=jnp.float32)
    key = jax.random.PRNGKey(0)
    fvs = jax.random.normal(key, (ns, fvdim), dtype=jnp.float32)

    ref = l1_aggregator_ref(q0, fvs)

    # Multi-tile + 2-way-split path: exercises the padding mask, the resident
    # output accumulators, and the cross-split merge (one split is part-pad).
    out_tiled = jax.block_until_ready(
        l1_aggregator(q0, fvs, tile_ns=8, num_splits=2))
    assert out_tiled.shape == (1, fvdim)
    # MXU matmuls (bf16 passes) are not bit-identical to the f32 XLA reference.
    assert jnp.allclose(out_tiled, ref, atol=3e-2, rtol=3e-2), (out_tiled, ref)

    # Default auto-tiled path (single tile / single split after clamping).
    out_auto = jax.block_until_ready(l1_aggregator(q0, fvs))
    assert out_auto.shape == (1, fvdim)
    assert jnp.allclose(out_auto, ref, atol=3e-2, rtol=3e-2), (out_auto, ref)

    # bf16 streamed-input path (halves HBM bytes; MXU consumes bf16 natively).
    fvs_bf16 = fvs.astype(jnp.bfloat16)
    ref_bf16 = l1_aggregator_ref(q0, fvs_bf16).astype(jnp.float32)
    out_bf16 = jax.block_until_ready(
        l1_aggregator(q0, fvs_bf16, tile_ns=8)).astype(jnp.float32)
    assert jnp.allclose(out_bf16, ref_bf16, atol=6e-2, rtol=6e-2), (out_bf16, ref_bf16)

    print("KERNEL_OK")
</pallas_src>

<mosaic_0001>
module attributes {stable_mosaic.version = 11 : i64} {
  func.func @_l1_agg_kernel(%arg0: i32, %arg1: i32, %arg2: memref<1x32xf32, #tpu.memory_space<vmem>>, %arg3: memref<8x32xf32, #tpu.memory_space<vmem>>, %arg4: memref<1x1x1xf32, #tpu.memory_space<vmem>>, %arg5: memref<1x1x1xf32, #tpu.memory_space<vmem>>, %arg6: memref<1x1x32xf32, #tpu.memory_space<vmem>>) attributes {dimension_semantics = [#tpu.dimension_semantics<parallel>, #tpu.dimension_semantics<arbitrary>], iteration_bounds = array<i64: 2, 2>, scalar_prefetch = 0 : i64, scratch_operands = 0 : i64, tpu.core_type = #tpu.core_type<tc>, window_params = [{pipeline_mode = #tpu.pipeline_mode<synchronous>, transform_indices = @transform_0, window_bounds = array<i64: 1, 32>}, {transform_indices = @transform_1, window_bounds = array<i64: 8, 32>}, {transform_indices = @transform_2, window_bounds = array<i64: 1, 1, 1>}, {transform_indices = @transform_3, window_bounds = array<i64: 1, 1, 1>}, {transform_indices = @transform_4, window_bounds = array<i64: 1, 1, 32>}]} {
    %c0_i32 = arith.constant 0 : i32
    %0 = arith.cmpi eq, %arg1, %c0_i32 : i32
    %1 = arith.extui %0 : i1 to i32
    %c0_i32_0 = arith.constant 0 : i32
    %2 = arith.cmpi ne, %1, %c0_i32_0 : i32
    scf.if %2 {
      %cst_26 = arith.constant -1.000000e+30 : f32
      %47 = vector.broadcast %cst_26 : f32 to vector<1x1xf32>
      %c0_27 = arith.constant 0 : index
      %c0_28 = arith.constant 0 : index
      %c0_29 = arith.constant 0 : index
      %48 = vector.load %arg4[%c0_27, %c0_28, %c0_29] : memref<1x1x1xf32, #tpu.memory_space<vmem>>, vector<1x1x1xf32>
      %49 = vector.shape_cast %48 : vector<1x1x1xf32> to vector<1x1xf32>
      %50 = vector.shape_cast %47 : vector<1x1xf32> to vector<1x1x1xf32>
      tpu.vector_store %arg4[%c0_27, %c0_28, %c0_29], %50 {strides = array<i32>} : memref<1x1x1xf32, #tpu.memory_space<vmem>>, vector<1x1x1xf32>,
      %cst_30 = arith.constant 0.000000e+00 : f32
      %51 = vector.broadcast %cst_30 : f32 to vector<1x1xf32>
      %c0_31 = arith.constant 0 : index
      %c0_32 = arith.constant 0 : index
      %c0_33 = arith.constant 0 : index
      %52 = vector.load %arg5[%c0_31, %c0_32, %c0_33] : memref<1x1x1xf32, #tpu.memory_space<vmem>>, vector<1x1x1xf32>
      %53 = vector.shape_cast %52 : vector<1x1x1xf32> to vector<1x1xf32>
      %54 = vector.shape_cast %51 : vector<1x1xf32> to vector<1x1x1xf32>
      tpu.vector_store %arg5[%c0_31, %c0_32, %c0_33], %54 {strides = array<i32>} : memref<1x1x1xf32, #tpu.memory_space<vmem>>, vector<1x1x1xf32>,
      %cst_34 = arith.constant 0.000000e+00 : f32
      %55 = vector.broadcast %cst_34 : f32 to vector<1x32xf32>
      %c0_35 = arith.constant 0 : index
      %c0_36 = arith.constant 0 : index
      %c0_37 = arith.constant 0 : index
      %56 = vector.load %arg6[%c0_35, %c0_36, %c0_37] : memref<1x1x32xf32, #tpu.memory_space<vmem>>, vector<1x1x32xf32>
      %57 = vector.shape_cast %56 : vector<1x1x32xf32> to vector<1x32xf32>
      %58 = vector.shape_cast %55 : vector<1x32xf32> to vector<1x1x32xf32>
      tpu.vector_store %arg6[%c0_35, %c0_36, %c0_37], %58 {strides = array<i32>} : memref<1x1x32xf32, #tpu.memory_space<vmem>>, vector<1x1x32xf32>,
    } else {
    }
    %c0 = arith.constant 0 : index
    %c0_1 = arith.constant 0 : index
    %3 = vector.load %arg2[%c0, %c0_1] : memref<1x32xf32, #tpu.memory_space<vmem>>, vector<1x32xf32>
    %c0_2 = arith.constant 0 : index
    %c0_3 = arith.constant 0 : index
    %4 = vector.load %arg3[%c0_2, %c0_3] : memref<8x32xf32, #tpu.memory_space<vmem>>, vector<8x32xf32>
    %cst = arith.constant dense<0.000000e+00> : vector<1x8xf32>
    %5 = tpu.matmul %3, %4, %cst {dimension_numbers = #tpu.dot_dimension_numbers<[1], [1], [0], [0], [0, 0, 1, 0], [], []>} : vector<1x32xf32>, vector<8x32xf32>, vector<1x8xf32> -> vector<1x8xf32>
    %c2_i32 = arith.constant 2 : i32
    %6 = arith.muli %arg0, %c2_i32 : i32
    %7 = arith.addi %6, %arg1 : i32
    %c8_i32 = arith.constant 8 : i32
    %8 = arith.muli %7, %c8_i32 : i32
    %9 = tpu.iota {dimensions = array<i32: 1>} : vector<1x8xi32>
    %10 = vector.broadcast %8 : i32 to vector<1x8xi32>
    %11 = arith.addi %9, %10 : vector<1x8xi32>
    %c20_i32 = arith.constant 20 : i32
    %12 = vector.broadcast %c20_i32 : i32 to vector<1x8xi32>
    %13 = arith.cmpi slt, %11, %12 : vector<1x8xi32>
    %cst_4 = arith.constant -1.000000e+30 : f32
    %14 = vector.broadcast %cst_4 : f32 to vector<1x8xf32>
    %15 = arith.select %13, %5, %14 : vector<1x8xi1>, vector<1x8xf32>
    %c0_5 = arith.constant 0 : index
    %c0_6 = arith.constant 0 : index
    %c0_7 = arith.constant 0 : index
    %16 = vector.load %arg4[%c0_5, %c0_6, %c0_7] : memref<1x1x1xf32, #tpu.memory_space<vmem>>, vector<1x1x1xf32>
    %17 = vector.shape_cast %16 : vector<1x1x1xf32> to vector<1x1xf32>
    %cst_8 = arith.constant dense<0xFF800000> : vector<1xf32>
    %18 = vector.multi_reduction <maximumf>, %15, %cst_8 [1] : vector<1x8xf32> to vector<1xf32>
    %19 = vector.shape_cast %18 : vector<1xf32> to vector<1x1xf32>
    %20 = arith.maximumf %17, %19 : vector<1x1xf32>
    %21 = arith.subf %17, %20 : vector<1x1xf32>
    %22 = math.exp %21 : vector<1x1xf32>
    %23 = vector.broadcast %20 : vector<1x1xf32> to vector<1x8xf32>
    %24 = arith.subf %15, %23 : vector<1x8xf32>
    %25 = math.exp %24 : vector<1x8xf32>
    %c0_9 = arith.constant 0 : index
    %c0_10 = arith.constant 0 : index
    %c0_11 = arith.constant 0 : index
    %26 = vector.load %arg5[%c0_9, %c0_10, %c0_11] : memref<1x1x1xf32, #tpu.memory_space<vmem>>, vector<1x1x1xf32>
    %27 = vector.shape_cast %26 : vector<1x1x1xf32> to vector<1x1xf32>
    %28 = arith.mulf %22, %27 : vector<1x1xf32>
    %cst_12 = arith.constant dense<0.000000e+00> : vector<1xf32>
    %29 = vector.multi_reduction <add>, %25, %cst_12 [1] : vector<1x8xf32> to vector<1xf32>
    %30 = vector.shape_cast %29 : vector<1xf32> to vector<1x1xf32>
    %31 = arith.addf %28, %30 : vector<1x1xf32>
    %c0_13 = arith.constant 0 : index
    %c0_14 = arith.constant 0 : index
    %c0_15 = arith.constant 0 : index
    %32 = vector.load %arg5[%c0_13, %c0_14, %c0_15] : memref<1x1x1xf32, #tpu.memory_space<vmem>>, vector<1x1x1xf32>
    %33 = vector.shape_cast %32 : vector<1x1x1xf32> to vector<1x1xf32>
    %34 = vector.shape_cast %31 : vector<1x1xf32> to vector<1x1x1xf32>
    tpu.vector_store %arg5[%c0_13, %c0_14, %c0_15], %34 {strides = array<i32>} : memref<1x1x1xf32, #tpu.memory_space<vmem>>, vector<1x1x1xf32>,
    %cst_16 = arith.constant dense<0.000000e+00> : vector<1x32xf32>
    %35 = tpu.matmul %25, %4, %cst_16 {dimension_numbers = #tpu.dot_dimension_numbers<[1], [0], [0], [1], [0, 0, 1, 1], [], []>} : vector<1x8xf32>, vector<8x32xf32>, vector<1x32xf32> -> vector<1x32xf32>
    %c0_17 = arith.constant 0 : index
    %c0_18 = arith.constant 0 : index
    %c0_19 = arith.constant 0 : index
    %36 = vector.load %arg6[%c0_17, %c0_18, %c0_19] : memref<1x1x32xf32, #tpu.memory_space<vmem>>, vector<1x1x32xf32>
    %37 = vector.shape_cast %36 : vector<1x1x32xf32> to vector<1x32xf32>
    %38 = vector.broadcast %22 : vector<1x1xf32> to vector<1x32xf32>
    %39 = arith.mulf %38, %37 : vector<1x32xf32>
    %40 = arith.addf %39, %35 : vector<1x32xf32>
    %c0_20 = arith.constant 0 : index
    %c0_21 = arith.constant 0 : index
    %c0_22 = arith.constant 0 : index
    %41 = vector.load %arg6[%c0_20, %c0_21, %c0_22] : memref<1x1x32xf32, #tpu.memory_space<vmem>>, vector<1x1x32xf32>
    %42 = vector.shape_cast %41 : vector<1x1x32xf32> to vector<1x32xf32>
    %43 = vector.shape_cast %40 : vector<1x32xf32> to vector<1x1x32xf32>
    tpu.vector_store %arg6[%c0_20, %c0_21, %c0_22], %43 {strides = array<i32>} : memref<1x1x32xf32, #tpu.memory_space<vmem>>, vector<1x1x32xf32>,
    %c0_23 = arith.constant 0 : index
    %c0_24 = arith.constant 0 : index
    %c0_25 = arith.constant 0 : index
    %44 = vector.load %arg4[%c0_23, %c0_24, %c0_25] : memref<1x1x1xf32, #tpu.memory_space<vmem>>, vector<1x1x1xf32>
    %45 = vector.shape_cast %44 : vector<1x1x1xf32> to vector<1x1xf32>
    %46 = vector.shape_cast %20 : vector<1x1xf32> to vector<1x1x1xf32>
    tpu.vector_store %arg4[%c0_23, %c0_24, %c0_25], %46 {strides = array<i32>} : memref<1x1x1xf32, #tpu.memory_space<vmem>>, vector<1x1x1xf32>,
    return
  }
  func.func @transform_0(%arg0: i32, %arg1: i32) -> (i32, i32) {
    %c0_i32 = arith.constant 0 : i32
    %c0_i32_0 = arith.constant 0 : i32
    %c0_i32_1 = arith.constant 0 : i32
    return %c0_i32, %c0_i32_0 : i32, i32
  }
  func.func @transform_1(%arg0: i32, %arg1: i32) -> (i32, i32) {
    %c2_i32 = arith.constant 2 : i32
    %0 = arith.muli %arg0, %c2_i32 : i32
    %1 = arith.addi %0, %arg1 : i32
    %c0_i32 = arith.constant 0 : i32
    %c0_i32_0 = arith.constant 0 : i32
    return %1, %c0_i32 : i32, i32
  }
  func.func @transform_2(%arg0: i32, %arg1: i32) -> (i32, i32, i32) {
    %c0_i32 = arith.constant 0 : i32
    %c0_i32_0 = arith.constant 0 : i32
    %c0_i32_1 = arith.constant 0 : i32
    return %arg0, %c0_i32, %c0_i32_0 : i32, i32, i32
  }
  func.func @transform_3(%arg0: i32, %arg1: i32) -> (i32, i32, i32) {
    %c0_i32 = arith.constant 0 : i32
    %c0_i32_0 = arith.constant 0 : i32
    %c0_i32_1 = arith.constant 0 : i32
    return %arg0, %c0_i32, %c0_i32_0 : i32, i32, i32
  }
  func.func @transform_4(%arg0: i32, %arg1: i32) -> (i32, i32, i32) {
    %c0_i32 = arith.constant 0 : i32
    %c0_i32_0 = arith.constant 0 : i32
    %c0_i32_1 = arith.constant 0 : i32
    return %arg0, %c0_i32, %c0_i32_0 : i32, i32, i32
  }
}

</mosaic_0001>

<bundles_post_ra>
// kernel: tpu_custom_call.1
= control target key start
LH: loop header
LB: loop body
LE: loop exit
PB: predicated region body
PF: predicated region fallthrough
CT: control target
= control target key end

     0   :  { %s1117_s0 = inlined_call_operand.hbm [shape: f32[1,32], index: 0, kind: input, shape index: {}]   ;;  %s1118_s1 = inlined_call_operand.hbm [shape: f32[32,32], index: 1, kind: input, shape index: {}]   ;;  %s1119_s2 = inlined_call_operand.vmem [shape: f32[2,1,1], index: 2, kind: output, shape index: {0}]   ;;  %s1120_s3 = inlined_call_operand.vmem [shape: f32[2,1,1], index: 3, kind: output, shape index: {1}]   ;;  %s1121_s4 = inlined_call_operand.hbm [shape: f32[2,1,32], index: 4, kind: output, shape index: {2}]  }
   0x1   :  { %1130 = sst [smem:[#allocation17_spill]] %s1117_s0 }
   0x2   :  { %1131 = sst [smem:[#allocation18_spill]] %s1119_s2 }
   0x3   :  { %1132 = sst [smem:[#allocation19_spill]] %s1120_s3 }
   0x4   :  { %1133 = sst [smem:[#allocation20_spill]] %s1121_s4 }
   0x5   :  { %10 = vsyncpa [#allocation3], 0 }
   0x6   :  { %11 = vsyncpa [#allocation6], 0 }
   0x7   :  { %13 = vsyncpa [#allocation6 + $0x1], 0 }
   0x8   :  { %14 = vsyncpa [#allocation4], 0 }
   0x9   :  { %16 = vsyncpa [#allocation4 + $0x1], 0  ;;  %s889_s15 = smov 0   ;;  %s891_s16 = smov 0  }
   0xa   :  { %s893_s17 = smov 0   ;;  %s895_s18 = smov 0  }
   0xb   :  { %s897_s19 = smov 0   ;;  %s899_s20 = smov 0  }
   0xc   :  { %s901_s21 = smov 0   ;;  %s903_s22 = smov 0  }
   0xd   :  { %s905_s23 = smov 0   ;;  %s907_s24 = smov 0  }
   0xe   :  { %s909_s25 = smov 0  }
   0xf LB: > { %1134 = sst [smem:[#allocation11_spill]] %s818_s15  ;;  %s529_s26 = sadd.s32 4294967295, %s858_s25   ;;  %s858_s25 = sphi %s909_s25, %s22_s25   ;;  %s854_s24 = sphi %s907_s24, %s1168_s24   ;;  %s850_s23 = sphi %s905_s23, %s1167_s23   ;;  %s846_s22 = sphi %s903_s22, %s1166_s22   ;;  %s842_s21 = sphi %s901_s21, %s1159_s21   ;;  %s838_s20 = sphi %s899_s20, %s1165_s20   ;;  %s834_s19 = sphi %s897_s19, %s1164_s19   ;;  %s830_s18 = sphi %s895_s18, %s1163_s18   ;;  %s826_s17 = sphi %s893_s17, %s1162_s17   ;;  %s822_s16 = sphi %s891_s16, %s1161_s16   ;;  %s818_s15 = sphi %s889_s15, %s1160_s15  }
  0x10   : > { %1135 = sst [smem:[#allocation12_spill]] %s842_s21  ;;  %s530_s27 = sadd.s32 4294967294, %s858_s25  }
  0x11   : > { %1136 = sst [smem:[#allocation13_spill]] %s846_s22  ;;  %p79_p0 = scmp.ne.s32.totalorder %s834_s19, %s830_s18 }
  0x12   : > { %1137 = sst [smem:[#allocation14_spill]] %s850_s23  ;;  %p945_p1 = scmp.eq.s32.totalorder %s529_s26, 0 }
  0x13   : > { %p154_p2 = scmp.ne.s32.totalorder %s826_s17, %s822_s16  ;;  %p155_p4 = scmp.eq.s32.totalorder %s529_s26, 3 }
  0x14   : > { %p954_p3 = por %p945_p1, %p79_p0  ;;  %p160_p5 = scmp.ne.s32.totalorder %s822_s16, %s818_s15 }
  0x15   : > { %p161_p6 = scmp.eq.s32.totalorder %s530_s27, 3  ;;  %p960_p7 = por %p155_p4, %p154_p2 }
  0x16   : > { %p533_p8 = scmp.ge.s32.totalorder %s858_s25, 1  ;;  %p168_p10 = scmp.lt.s32.totalorder %s858_s25, 5 }
  0x17   : > { %s1140_s5 = scalar_select %p960_p7, 1, 0 }
  0x18   : > { %p965_p9 = por %p161_p6, %p160_p5  ;;  %s1144_s0 = sld [smem:[#allocation17_spill]] }
  0x19   : > { %1141 = sst [smem:[#allocation15_spill]] %s1140_s5  ;;  %p973_p11 = pnand %p533_p8, %p168_p10 }
  0x1a   : > { %s1142_s6 = scalar_select %p965_p9, 1, 0 }
  0x1b   : > { %p558_p12 = pneg %p973_p11  ;;  %s860_s11 = smov [#allocation2]  }
  0x1c   : > { %1143 = sst [smem:[#allocation16_spill]] %s1142_s6  ;;  %s182_s12 = sshll.u32 %s860_s11, 4  ;;  %s183_s12 = int_to_ptr.vmem [resolvable:$true] %s182_s12 }
  0x1d   : > { %p559_p13 = pnand %p558_p12, %p945_p1  ;;  %s31_s13 = sadd.s32 1, %s850_s23 }
  0x1e   : > { %s180_s9 = sshll.u32 %s1144_s0, 4  ;;  %p32_p0 = scmp.ge.s32.totalorder %s31_s13, 2  ;;  %s181_s9 = int_to_ptr.hbm [resolvable:$true] %s180_s9 }
  0x1f   : > { %561 = dma.hbm_to_vmem [thread:$0]  (!%p559_p13), %s181_s9, 16, %s183_s12, [#allocation3]  }
  0x20   : > { %s34_s14 = sadd.s32 1, %s854_s24  ;;  %s531_s18 = sshll.u32 %s854_s24, 1 }
  0x21   : > { %s66_s26 = sadd.s32 1, %s838_s20  ;;  %s1170_s13 = smov (%p32_p0, %s31_s13), 0 }
  0x22   : > { %s1172_s14 = smov (!%p32_p0, %s34_s14), %s854_s24  ;;  %s60_s27 = sadd.s32 %s850_s23, %s531_s18 }
  0x23   : > { %p73_p2 = scmp.ne.s32.totalorder %s838_s20, %s834_s19  ;;  %p36_p4 = scmp.ge.s32.totalorder %s1172_s14, 2 }
  0x24   : > { %p74_p5 = scmp.eq.s32.totalorder %s858_s25, 0  ;;  %p571_p6 = scmp.lt.s32.totalorder %s858_s25, 4 }
  0x25   : > { %s193_s7 = sand.u32 1, %s838_s20   ;;  %s1174_s14 = smov (%p36_p4, %s1172_s14), 0 }
  0x26   : > { %p996_p8 = por %p74_p5, %p73_p2  ;;  %s532_s9 = sshll.u32 %s1174_s14, 1 }
  0x27   : > { %s141_s11 = ssub.s32 %s854_s24, %s1174_s14  ;;  %s62_s12 = sadd.s32 %s532_s9, %s1170_s13 }
  0x28   : > { %p142_p10 = scmp.eq.s32.totalorder %s141_s11, 0  ;;  %s63_s18 = ssub.s32 %s60_s27, %s62_s12 }
  0x29   : > { %s536_s29 = sshll.u32 %s193_s7, 3  ;;  %p64_p12 = scmp.eq.s32.totalorder %s63_s18, 0 }
  0x2a   : > { %s1147_s0 = sadd.s32 1, %s826_s17  ;;  %s538_s15 = sshll.u32 %s60_s27, 3 }
  0x2b   : > { %s1007_s23 = scalar_select %p142_p10, %s826_s17, %s1147_s0  }
  0x2c   : > { %s1010_s6 = scalar_select %p64_p12, %s838_s20, %s66_s26  }
  0x2d   : > { %s197_s5 = scalar_lea.vmem [#allocation5], %s536_s29  ;;  %s203_s2 = scalar_lea.hbm %s1118_s1, %s538_s15 }
  0x2e   : > { %s207_s4 = sshll.u32 %s197_s5, 4  ;;  %s205_s22 = sshll.u32 %s203_s2, 4  ;;  %s208_s4 = int_to_ptr.vmem [resolvable:$true] %s207_s4  ;;  %s206_s22 = int_to_ptr.hbm [resolvable:$true] %s205_s22 }
  0x2f   : > { %p563_p13 = pnand %p571_p6, %p996_p8  ;;  %s194_s9 = scalar_lea.sflag [#allocation6], %s193_s7 }
  0x30   : > { %216 = sbr.rel (%p973_p11) target bundleno = 588 (0x24c), region = 28 }
  0x31   : > { %565 = dma.hbm_to_vmem [thread:$0]  (!%p563_p13), %s206_s22, 128, %s208_s4, %s194_s9  }
  0x35   : > { %805 = dma.done.wait (%p945_p1), [#allocation3], 16  }
  0x36   : > { %807 = vsyncadd (%p945_p1), [#allocation3], 4294967280  ;;  %s223_s0 = sand.u32 1, %s834_s19  }
  0x37   : > { %s541_s3 = sshll.u32 %s223_s0, 3  ;;  %s224_s2 = scalar_lea.sflag [#allocation6], %s223_s0 }
  0x38   : > { %s227_s15 = scalar_lea.vmem [#allocation5], %s541_s3 }
  0x39   : > { %809 = dma.done.wait (%p954_p3), %s224_s2, 128  }
  0x3a   : > { %811 = vsyncadd (%p954_p3), %s224_s2, 4294967168  ;;  %s1148_s4 = sld [smem:[#allocation13_spill]]  ;;  %s256_s21 = sand.u32 1, %s822_s16  }
  0x3b   : > { %s1149_s29 = sld [smem:[#allocation18_spill]]  ;;  %s1045_s30 = scalar_lea.vmem [#allocation7], %s256_s21 }
  0x3c   : > { %s1150_s27 = sld [smem:[#allocation19_spill]] }
  0x3d   : > { %s1151_s8 = sld [smem:[#allocation12_spill]] }
  0x40   : > { %p260_p11 = scmp.lt.s32.totalorder %s1148_s4, 1 }
  0x42   : > { %s1176_s4 = smov (!%p260_p11, %s1148_s4), 1 }
  0x43   : > { %s1036_s5 = scalar_lea.vmem %s1149_s29, %s1176_s4  ;;  %s1041_s7 = scalar_lea.vmem %s1150_s27, %s1176_s4 }
  0x44   : > { %p542_p1 = scmp.ne.s32.totalorder %s1151_s8, 0 }
  0x46   : > { %269 = sbr.rel (%p542_p1) target bundleno = 79 (0x4f), region = 40 }
  0x4b   : > { %vm270_vm0 = vcmask 0   ;;  %vm273_vm1 = vcmask 253952   ;;  %v861_v0 = vmov -1e+30   ;;  %v862_v1 = vmov 0.0  }
  0x4c   : > { %271 = vst.msk [vmem:[%s1036_s5] sm:$0x1] %vm270_vm0, %v861_v0 }
  0x4d   : > { %272 = vst.msk [vmem:[%s1041_s7] sm:$0x1] %vm270_vm0, %v862_v1 }
  0x4e   : > { %274 = vst.msk [vmem:[%s1045_s30] sm:$0x1] %vm273_vm1, %v862_v1 }
  0x4f PF: > { %v276_v2 = vld [vmem:[%s227_s15] sm:$0xff]  ;;  %s1152_s11 = sld [smem:[#allocation13_spill]]  ;;  %vm277_vm2 = vcmask 261120   ;;  %v275_v3 = vld [vmem:[#allocation2] sm:$0x1]  ;;  %v307_v4 = vlaneseq  ;;  %vm314_vm4 = vcmask 57344  }
  0x50   : > { %s1153_s12 = sld [smem:[#allocation12_spill]]  ;;  %543 = vmatpush.xpose.msk.msra.mxu0 %vm277_vm2, %v276_v2  ;;  %358 = vmatpush.msra.mxu1 %v276_v2  ;;  %v863_v11 = vmov 0   ;;  %vm337_vm5 = vcmask 0   ;;  %vm339_vm6 = vcmask 64512   ;;  %s398_s29 = sshll.u32 %s1045_s30, 4  ;;  %vm372_vm7 = vcmask 253952   ;;  %s399_s29 = int_to_ptr.vmem [resolvable:$true] %s398_s29 }
  0x51   : > { %v308_v5 = vand.u32 127, %v307_v4  ;;  %666 = vset.pattern.permute.xlu0 %v863_v11  ;;  %667 = vset.pattern.permute.xlu1 %v863_v11  ;;  %s1154_s15 = sld [smem:[#allocation20_spill]]  ;;  %s382_s10 = scalar_lea.sflag [#allocation4], %s256_s21 }
  0x53   : > { %544 = vmatmul.msk.f32.vlgmr.msra.gmra.mxu0 %vm277_vm2, %v275_v3  ;;  %v313_v12 = vld [vmem:[%s1036_s5] sm:$0x1] }
  0x54   : > { %v331_v25 = vld [vmem:[%s1041_s7] sm:$0x1] }
  0x55   : > { %s545_s18 = sshll.u32 %s1152_s11, 1  ;;  %v363_v30 = vld [vmem:[%s1045_s30] sm:$0x1] }
  0x56   : > { %s305_s9 = sadd.s32 %s1153_s12, %s545_s18 }
  0x57   : > { %s546_s0 = sshll.u32 %s305_s9, 3  ;;  %s1155_s4 = smov %s1154_s15 }
  0x58   : > { %v309_v6 = vstv %s546_s0  ;;  %s396_s22 = scalar_lea.hbm %s1154_s15, %s1152_s11  ;;  %s752_s11 = scalar_lea.hbm %s1155_s4, 2 }
  0x59   : > { %v310_v7 = vadd.s32 %v309_v6, %v308_v5 }
  0x5b   : > { %vm311_vm3 = vcmp.lt.s32.totalorder %v310_v7, 20 }
  0xd0   : > { %v301_v8 = vpop.f32.mrf.mxu0 }
  0xd1   : > { %v312_v9 = vsel %vm311_vm3, %v301_v8, -1e+30 }
  0xd2   : > { %v315_v10 = vsel %vm314_vm4, %v312_v9, -inf }
  0xd3   : > { %316 = vmax.xlane.f32.xlu0 %v315_v10 }
 0x146   : > { %v317_v13 = vpop.xlane.xlu0 %316 }
 0x147   : > { %v318_v14 = vmax.f32 %v313_v12, %v317_v13 }
 0x149   : > { %v319_v15 = vsub.f32 %v313_v12, %v318_v14  ;;  %374 = vst.msk [vmem:[%s1036_s5] sm:$0x1] %vm337_vm5, %v318_v14  ;;  %324 = vperm.xlu0 %666, %v318_v14   ;;  %s400_s5 = sshll.u32 %s396_s22, 4  ;;  %s401_s5 = int_to_ptr.hbm [resolvable:$true] %s400_s5 }
 0x14a   : > { %s746_s26 = sshra.s32 %s401_s5, 4  ;;  %s747_s26 = int_to_ptr.hbm [resolvable:$true] %s746_s26 }
 0x14b   : > { %v320_v16 = vmul.f32 1.442695, %v319_v15  ;;  %s748_s27 = scalar_lea.hbm %s747_s26, 1  ;;  %p753_p4 = scmp.lt.s32.totalorder %s747_s26, %s1155_s4 }
 0x14c   : > { %p749_p3 = scmp.ne.s32.totalorder %s747_s26, %s748_s27  ;;  %p754_p5 = scmp.lt.s32.totalorder %s752_s11, %s748_s27 }
 0x14d   : > { %668 = vpow2.f32 %v320_v16 }
 0x14e   : > { %p750_p0 = pnand %p749_p3, %p960_p7  ;;  %p755_p6 = por %p754_p5, %p753_p4 }
 0x150   : > { %p751_p2 = pneg %p750_p0 }
 0x152   : > { %p756_p8 = pnand %p755_p6, %p751_p2 }
 0x153   : > { %v669_v17 = vpop.eup %668 }
 0x154   : > { %366 = vperm.xlu1 %667, %v669_v17   ;;  %v332_v26 = vmul.f32 %v669_v17, %v331_v25 }
 0x1bb   : > { %v325_v18 = vpop.permute.xlu0 %324 }
 0x1bc   : > { %v327_v19 = vperm.slane %v325_v18, 0 }
 0x1be   : > { %v328_v20 = vsub.f32 %v312_v9, %v327_v19 }
 0x1c0   : > { %v329_v21 = vmul.f32 1.442695, %v328_v20 }
 0x1c2   : > { %670 = vpow2.f32 %v329_v21 }
 0x1c6   : > { %v367_v24 = vpop.permute.xlu1 %366 }
 0x1c7   : > { %v369_v29 = vperm.slane %v367_v24, 0 }
 0x1c8   : > { %v671_v22 = vpop.eup %670 }
 0x1c9   : > { %547 = vmatmul.msk.f32.vlgmr.msra.gmra.mxu1 %vm339_vm6, %v671_v22  ;;  %v333_v23 = vsel %vm314_vm4, %v671_v22, 0.0  ;;  %v370_v31 = vmul.f32 %v369_v29, %v363_v30 }
 0x1ca   : > { %334 = vadd.xlane.f32.xlu1 %v333_v23 }
 0x23d   : > { %v335_v27 = vpop.xlane.xlu1 %334 }
 0x23e   : > { %v336_v28 = vadd.f32 %v335_v27, %v332_v26 }
 0x240   : > { %338 = vst.msk [vmem:[%s1041_s7] sm:$0x1] %vm337_vm5, %v336_v28 }
 0x246   : > { %v360_v32 = vpop.f32.mrf.mxu1 }
 0x247   : > { %v371_v33 = vadd.f32 %v370_v31, %v360_v32 }
 0x249   : > { %373 = vst.msk [vmem:[%s1045_s30] sm:$0x1] %vm372_vm7, %v371_v33 }
 0x24a   : > { %759 = shalt.err (!%p756_p8)
}
 0x24b   : > { %556 = dma.vmem_to_hbm [thread:$0]  (%p960_p7), %s399_s29, 16, %s401_s5, %s382_s10  }
 0x24c PF: > { %s1157_s21 = sld [smem:[#allocation11_spill]]  ;;  %p573_p10 = scmp.ge.s32.totalorder %s858_s25, 2 }
 0x24e   : > { %p567_p12 = pnand %p573_p10, %p965_p9 }
 0x250   : > { %p568_p13 = pneg %p567_p12 }
 0x252   : > { %s424_s9 = sand.u32 1, %s1157_s21  }
 0x253   : > { %s425_s0 = scalar_lea.sflag [#allocation4], %s424_s9 }
 0x254   : > { %813 = dma.done.wait (%p568_p13), %s425_s0, 16  }
 0x255   : > { %815 = vsyncadd (%p568_p13), %s425_s0, 4294967280  ;;  %s22_s25 = sadd.s32 1, %s858_s25   ;;  %s1159_s21 = sld [smem:[#allocation14_spill]] }
 0x256   : > { %p19_p11 = scmp.ge.s32.totalorder %s22_s25, 6   ;;  %s1160_s15 = smov %s822_s16 }
 0x257   : > { %s1161_s16 = smov %s826_s17  ;;  %s1162_s17 = smov %s1007_s23 }
 0x258   : > { %s1163_s18 = smov %s834_s19  ;;  %s1164_s19 = smov %s838_s20 }
 0x259   : > { %s1165_s20 = smov %s1010_s6  ;;  %s1166_s22 = smov %s854_s24 }
 0x25a   : > { %s1167_s23 = smov %s1170_s13  ;;  %s1168_s24 = smov %s1174_s14 }
 0x25b   :  { %21 = sbr.rel (!%p19_p11) target bundleno = 15 (0xf), region = 106 }
 0x260   :  { %430 = vsyncpa [#allocation3], 1 }
 0x261   :  { %432 = vsyncpa [#allocation3 + $0x1], 1 }
 0x262   :  { %433 = vsyncpa [#allocation6], 1 }
 0x263   :  { %435 = vsyncpa [#allocation6 + $0x1], 1 }
 0x264   :  { %436 = vsyncpa [#allocation4], 1 }
 0x265   :  { %438 = vsyncpa [#allocation4 + $0x1], 1 }

</bundles_post_ra>
